<compile_context>
chip_gen: v5e
topology: v5e:2x2
jax: 0.10.0
libtpu: 0.0.40
codegen_flags: <defaults>
</compile_context>

<pallas_src>
import functools

import jax
import jax.numpy as jnp
from jax.experimental import pallas as pl
from jax.experimental.pallas import tpu as pltpu


def _quad_kernel(x_ref, o_ref, *, ab, a):
    # x_ref: (BLOCK_ROWS, W) VMEM tile; o_ref: same (leading 1 dim squeezed).
    xt = x_ref[...]
    # a * x * (b * x - 1)  ==  x * (a*b*x - a)   (constants folded)
    o_ref[...] = xt * (ab * xt - a)


def _round_up(n, m):
    return ((n + m - 1) // m) * m


def quadratic_decoder(x, a, b, *, block_rows=2048):
    """x: (T, H, W) f32; a, b: python scalars.

    Returns (1, T, H, W), matching torch.unsqueeze(torch.stack([...], 0), 0).
    """
    T, H, W = x.shape
    R = T * H
    x2d = x.reshape(R, W)  # pure elementwise op -> flatten to 2D for big tiles

    # Block row count: multiple of 8 (f32 sublane tiling), capped so one tile
    # is ~1 MiB at W=128 (well under scoped VMEM with 2x double buffering).
    br = min(block_rows, _round_up(R, 8))
    r_pad = _round_up(R, br)
    if r_pad != R:
        x2d = jnp.pad(x2d, ((0, r_pad - R), (0, 0)))

    grid = (r_pad // br,)
    kernel = functools.partial(_quad_kernel, ab=float(a) * float(b), a=float(a))

    out = pl.pallas_call(
        kernel,
        out_shape=jax.ShapeDtypeStruct((1, r_pad, W), x.dtype),
        grid_spec=pl.GridSpec(
            grid=grid,
            in_specs=[pl.BlockSpec((br, W), lambda i: (i, 0))],
            # Leading dim is the torch unsqueeze: size-1, squeezed in-kernel.
            out_specs=pl.BlockSpec((None, br, W), lambda i: (0, i, 0)),
        ),
        compiler_params=pltpu.CompilerParams(
            dimension_semantics=("parallel",),
        ),
    )(x2d)

    if r_pad != R:
        out = out[:, :R, :]
    # Metadata-only reshape back to (1, T, H, W).
    return out.reshape(1, T, H, W)


if __name__ == "__main__":
    key = jax.random.PRNGKey(0)
    T, H, W = 8, 16, 128  # small sequence of (H, W) frames
    x = jax.random.normal(key, (T, H, W), dtype=jnp.float32)

    # Deterministic "parameters" of the module (plain scalars in __init__).
    a = 1.5
    b = 0.75

    y = quadratic_decoder(x, a, b)
    y = jax.block_until_ready(y)

    # Pure-JAX reference (identical semantics to the torch loop).
    y_ref = (a * x * (b * x - 1.0))[None]

    assert y.shape == (1, T, H, W), y.shape
    assert jnp.allclose(y, y_ref, atol=1e-6, rtol=1e-6), "mismatch vs reference"

    print("KERNEL_OK")
</pallas_src>

<mosaic_0001>
module attributes {stable_mosaic.version = 11 : i64} {
  func.func @_quad_kernel(%arg0: i32, %arg1: memref<128x128xf32, #tpu.memory_space<vmem>>, %arg2: memref<1x128x128xf32, #tpu.memory_space<vmem>>) attributes {dimension_semantics = [#tpu.dimension_semantics<parallel>], iteration_bounds = array<i64: 1>, scalar_prefetch = 0 : i64, scratch_operands = 0 : i64, tpu.core_type = #tpu.core_type<tc>, window_params = [{transform_indices = @transform_0, window_bounds = array<i64: 128, 128>}, {transform_indices = @transform_1, window_bounds = array<i64: 1, 128, 128>}]} {
    %c0 = arith.constant 0 : index
    %c0_0 = arith.constant 0 : index
    %0 = vector.load %arg1[%c0, %c0_0] : memref<128x128xf32, #tpu.memory_space<vmem>>, vector<128x128xf32>
    %cst = arith.constant 1.125000e+00 : f32
    %1 = vector.broadcast %cst : f32 to vector<128x128xf32>
    %2 = arith.mulf %1, %0 : vector<128x128xf32>
    %cst_1 = arith.constant 1.500000e+00 : f32
    %3 = vector.broadcast %cst_1 : f32 to vector<128x128xf32>
    %4 = arith.subf %2, %3 : vector<128x128xf32>
    %5 = arith.mulf %0, %4 : vector<128x128xf32>
    %c0_2 = arith.constant 0 : index
    %c0_3 = arith.constant 0 : index
    %c0_4 = arith.constant 0 : index
    %6 = vector.load %arg2[%c0_2, %c0_3, %c0_4] : memref<1x128x128xf32, #tpu.memory_space<vmem>>, vector<1x128x128xf32>
    %7 = vector.shape_cast %6 : vector<1x128x128xf32> to vector<128x128xf32>
    %8 = vector.shape_cast %5 : vector<128x128xf32> to vector<1x128x128xf32>
    tpu.vector_store %arg2[%c0_2, %c0_3, %c0_4], %8 {strides = array<i32>} : memref<1x128x128xf32, #tpu.memory_space<vmem>>, vector<1x128x128xf32>,
    return
  }
  func.func @transform_0(%arg0: i32) -> (i32, i32) {
    %c0_i32 = arith.constant 0 : i32
    %c0_i32_0 = arith.constant 0 : i32
    return %arg0, %c0_i32 : i32, i32
  }
  func.func @transform_1(%arg0: i32) -> (i32, i32, i32) {
    %c0_i32 = arith.constant 0 : i32
    %c0_i32_0 = arith.constant 0 : i32
    %c0_i32_1 = arith.constant 0 : i32
    return %c0_i32, %arg0, %c0_i32_0 : i32, i32, i32
  }
}

</mosaic_0001>

<bundles_post_ra>
// kernel: tpu_custom_call.1
= control target key start
LH: loop header
LB: loop body
LE: loop exit
PB: predicated region body
PF: predicated region fallthrough
CT: control target
= control target key end

     0   :  { %6 = vsyncpa [#allocation3], 0  ;;  %s222_s0 = inlined_call_operand.hbm [shape: f32[128,128], index: 0, kind: input, shape index: {}]   ;;  %s223_s1 = inlined_call_operand.hbm [shape: f32[1,128,128], index: 1, kind: output, shape index: {}]  }
   0x1   :  { %7 = vsyncpa [#allocation4], 0  ;;  %s12_s8 = sshll.u32 %s222_s0, 4  ;;  %s196_s9 = smov [#allocation2]   ;;  %s13_s8 = int_to_ptr.hbm [resolvable:$true] %s12_s8 }
   0x2   :  { %s14_s10 = sshll.u32 %s196_s9, 4  ;;  %s197_s11 = smov 128   ;;  %s15_s10 = int_to_ptr.vmem [resolvable:$true] %s14_s10 }
   0x3   :  { %s198_s12 = smov 8  }
   0x4   :  { %20 = dma.hbm_to_vmem [thread:$0]  %s13_s8, 2048, %s15_s10, [#allocation3], %s197_s11, %s197_s11, %s198_s12  }
   0x5   :  { %192 = dma.done.wait [#allocation3], 2048  }
   0x6   :  { %193 = vsyncadd [#allocation3], 4294965248  ;;  %v25_v0 = vld [vmem:[#allocation2] sm:$0xff]  ;;  %v26_v1 = vld [vmem:[#allocation2 + $0x8] sm:$0xff]  ;;  %s199_s0 = smov [#allocation5]   ;;  %s111_s16 = sshll.u32 %s223_s1, 4  ;;  %s112_s16 = int_to_ptr.hbm [resolvable:$true] %s111_s16 }
   0x7   :  { %v27_v2 = vld [vmem:[#allocation2 + $0x10] sm:$0xff]  ;;  %v41_v3 = vmul.f32 1.125, %v25_v0  ;;  %v42_v4 = vmul.f32 1.125, %v26_v1  ;;  %v28_v6 = vld [vmem:[#allocation2 + $0x18] sm:$0xff]  ;;  %v29_v7 = vld [vmem:[#allocation2 + $0x20] sm:$0xff]  ;;  %s109_s13 = sshll.u32 %s199_s0, 4  ;;  %s110_s13 = int_to_ptr.vmem [resolvable:$true] %s109_s13 }
   0x8   :  { %v43_v5 = vmul.f32 1.125, %v27_v2  ;;  %v30_v8 = vld [vmem:[#allocation2 + $0x28] sm:$0xff]  ;;  %v44_v9 = vmul.f32 1.125, %v28_v6  ;;  %v45_v10 = vmul.f32 1.125, %v29_v7  ;;  %v31_v12 = vld [vmem:[#allocation2 + $0x30] sm:$0xff]  ;;  %v32_v13 = vld [vmem:[#allocation2 + $0x38] sm:$0xff] }
   0x9   :  { %v46_v11 = vmul.f32 1.125, %v30_v8  ;;  %v124_v14 = vadd.f32 -1.5, %v41_v3  ;;  %v125_v15 = vadd.f32 -1.5, %v42_v4  ;;  %v47_v17 = vmul.f32 1.125, %v31_v12  ;;  %v33_v18 = vld [vmem:[#allocation2 + $0x40] sm:$0xff]  ;;  %v34_v23 = vld [vmem:[#allocation2 + $0x48] sm:$0xff] }
   0xa   :  { %v126_v16 = vadd.f32 -1.5, %v43_v5  ;;  %v127_v19 = vadd.f32 -1.5, %v44_v9  ;;  %v128_v20 = vadd.f32 -1.5, %v45_v10  ;;  %v48_v22 = vmul.f32 1.125, %v32_v13  ;;  %v35_v24 = vld [vmem:[#allocation2 + $0x50] sm:$0xff]  ;;  %v36_v29 = vld [vmem:[#allocation2 + $0x58] sm:$0xff] }
   0xb   :  { %v129_v21 = vadd.f32 -1.5, %v46_v11  ;;  %v73_v25 = vmul.f32 %v124_v14, %v25_v0  ;;  %v74_v26 = vmul.f32 %v125_v15, %v26_v1  ;;  %v130_v28 = vadd.f32 -1.5, %v47_v17  ;;  %v37_v30 = vld [vmem:[#allocation2 + $0x60] sm:$0xff]  ;;  %v38_v31 = vld [vmem:[#allocation2 + $0x68] sm:$0xff]  ;;  %v39_v35 = vld [vmem:[#allocation2 + $0x70] sm:$0xff] }
   0xc   :  { %v75_v27 = vmul.f32 %v126_v16, %v27_v2  ;;  %v76_v32 = vmul.f32 %v127_v19, %v28_v6  ;;  %v77_v33 = vmul.f32 %v128_v20, %v29_v7  ;;  %v131_v34 = vadd.f32 -1.5, %v48_v22  ;;  %v40_v40 = vld [vmem:[#allocation2 + $0x78] sm:$0xff] }
   0xd   :  { %89 = vst [vmem:[#allocation5] sm:$0xff] %v73_v25  ;;  %v78_v36 = vmul.f32 %v129_v21, %v30_v8  ;;  %v49_v37 = vmul.f32 1.125, %v33_v18  ;;  %v50_v38 = vmul.f32 1.125, %v34_v23  ;;  %v51_v39 = vmul.f32 1.125, %v35_v24 }
   0xe   :  { %90 = vst [vmem:[#allocation5 + $0x8] sm:$0xff] %v74_v26  ;;  %v79_v41 = vmul.f32 %v130_v28, %v31_v12  ;;  %v52_v42 = vmul.f32 1.125, %v36_v29  ;;  %v53_v43 = vmul.f32 1.125, %v37_v30  ;;  %v54_v44 = vmul.f32 1.125, %v38_v31 }
   0xf   :  { %91 = vst [vmem:[#allocation5 + $0x10] sm:$0xff] %v75_v27  ;;  %v132_v45 = vadd.f32 -1.5, %v49_v37  ;;  %v133_v46 = vadd.f32 -1.5, %v50_v38  ;;  %v134_v47 = vadd.f32 -1.5, %v51_v39  ;;  %v55_v48 = vmul.f32 1.125, %v39_v35 }
  0x10   :  { %92 = vst [vmem:[#allocation5 + $0x18] sm:$0xff] %v76_v32  ;;  %v80_v49 = vmul.f32 %v131_v34, %v32_v13  ;;  %v135_v50 = vadd.f32 -1.5, %v52_v42  ;;  %v56_v51 = vmul.f32 1.125, %v40_v40  ;;  %v136_v53 = vadd.f32 -1.5, %v53_v43 }
  0x11   :  { %93 = vst [vmem:[#allocation5 + $0x20] sm:$0xff] %v77_v33  ;;  %v81_v52 = vmul.f32 %v132_v45, %v33_v18  ;;  %v82_v54 = vmul.f32 %v133_v46, %v34_v23  ;;  %v137_v55 = vadd.f32 -1.5, %v54_v44  ;;  %v83_v56 = vmul.f32 %v134_v47, %v35_v24 }
  0x12   :  { %94 = vst [vmem:[#allocation5 + $0x28] sm:$0xff] %v78_v36  ;;  %v138_v57 = vadd.f32 -1.5, %v55_v48  ;;  %v84_v58 = vmul.f32 %v135_v50, %v36_v29  ;;  %v139_v59 = vadd.f32 -1.5, %v56_v51  ;;  %v85_v60 = vmul.f32 %v136_v53, %v37_v30 }
  0x13   :  { %95 = vst [vmem:[#allocation5 + $0x30] sm:$0xff] %v79_v41  ;;  %v86_v61 = vmul.f32 %v137_v55, %v38_v31 }
  0x14   :  { %96 = vst [vmem:[#allocation5 + $0x38] sm:$0xff] %v80_v49  ;;  %v87_v62 = vmul.f32 %v138_v57, %v39_v35  ;;  %v88_v63 = vmul.f32 %v139_v59, %v40_v40 }
  0x15   :  { %97 = vst [vmem:[#allocation5 + $0x40] sm:$0xff] %v81_v52 }
  0x16   :  { %98 = vst [vmem:[#allocation5 + $0x48] sm:$0xff] %v82_v54 }
  0x17   :  { %99 = vst [vmem:[#allocation5 + $0x50] sm:$0xff] %v83_v56 }
  0x18   :  { %100 = vst [vmem:[#allocation5 + $0x58] sm:$0xff] %v84_v58 }
  0x19   :  { %101 = vst [vmem:[#allocation5 + $0x60] sm:$0xff] %v85_v60 }
  0x1a   :  { %102 = vst [vmem:[#allocation5 + $0x68] sm:$0xff] %v86_v61 }
  0x1b   :  { %103 = vst [vmem:[#allocation5 + $0x70] sm:$0xff] %v87_v62 }
  0x1c   :  { %104 = vst [vmem:[#allocation5 + $0x78] sm:$0xff] %v88_v63 }
  0x1d   :  { %117 = dma.vmem_to_hbm [thread:$0]  %s110_s13, 2048, %s112_s16, [#allocation4], %s197_s11, %s197_s11, %s198_s12  }
  0x1e   :  { %194 = dma.done.wait [#allocation4], 2048  }
  0x1f   :  { %195 = vsyncadd [#allocation4], 4294965248 }
  0x20   :  { %122 = vsyncpa [#allocation3], 1 }
  0x21   :  { %123 = vsyncpa [#allocation4], 1 }

</bundles_post_ra>
